<compile_context>
chip_gen: v6e
topology: v6e:2x2x1
jax: 0.10.0
libtpu: 0.0.40
codegen_flags: <defaults>
</compile_context>

<pallas_src>
import jax
import jax.numpy as jnp
from jax.experimental import pallas as pl
from jax.experimental.pallas import tpu as pltpu

# Dataset configs (mean / std / input_size), as in the PyTorch module.
DATASET_CONFIG = {
    'svhn': ([0.4376821, 0.4437697, 0.47280442],
             [0.19803012, 0.20101562, 0.19703614], 32),
    'cifar10': ([0.49139968, 0.48215841, 0.44653091],
                [0.24703223, 0.24348513, 0.26158784], 32),
    'imagenet100': ([0.485, 0.456, 0.406],
                    [0.229, 0.224, 0.225], 224),
}


def get_dataset_params(dataset):
    """JAX equivalent of get_dataset_params: (1,3,R,R) mean and std maps.

    Kept for parity with the PyTorch module / reference checks; the Pallas
    kernel itself does NOT consume these tensors.
    """
    mean_c, std_c, resol = DATASET_CONFIG[dataset]
    mean = jnp.stack(
        [jnp.full((resol, resol), m, dtype=jnp.float32) for m in mean_c])[None]
    std = jnp.stack(
        [jnp.full((resol, resol), s, dtype=jnp.float32) for s in std_c])[None]
    return mean, std


def _target_block_bytes():
    """Per-generation logical block size for the x stream (out is same size).

    2 streams * 2 double-buffers of this size must stay under the scoped-VMEM
    default (16 MiB on v5e, 32 MiB on v6e/v7x) -> 2 MiB on v5-class, 6 MiB
    elsewhere (24 MiB total, well inside defaults).
    """
    try:
        kind = jax.devices()[0].device_kind.lower()
    except Exception:  # pragma: no cover - e.g. no backend at trace time
        return 2 * 1024 * 1024
    if "v5" in kind or "v4" in kind:
        return 2 * 1024 * 1024
    return 6 * 1024 * 1024


def _choose_row_block(total_rows, row_bytes):
    """Pick the sublane (row) block size for the (N*C, HW) layout."""
    if total_rows <= 8:
        return total_rows                       # single full block
    target = _target_block_bytes()
    rb = min(total_rows, max(8, target // max(row_bytes, 1)))
    rb = max(8, (rb // 8) * 8)                  # sublane-aligned

    # Megacore (v7x): keep at least 2 grid steps when there is enough work so
    # both TensorCores stream data.
    if total_rows >= 16:
        half = -(-total_rows // 2)              # ceil(total/2)
        rb = min(rb, max(8, (half // 8) * 8))

    # Prefer a block that evenly divides total_rows (avoids a nearly-empty
    # masked last step), but only if it doesn't shrink the block by >2x.
    if total_rows % rb:
        cand = rb
        while cand >= max(8, rb // 2):
            if total_rows % cand == 0:
                rb = cand
                break
            cand -= 8
    return min(rb, total_rows)


def _inverse_transform_kernel(x_ref, scale_ref, bias_ref, o_ref):
    """o = x * (std*255) + (mean*255); scale/bias are (rows_blk, 1) columns."""
    x = x_ref[...]                               # (rows_blk, HW)
    s = scale_ref[...]                           # (rows_blk, 1) f32
    b = bias_ref[...]                            # (rows_blk, 1) f32
    # Single FMA per element, computed in f32, cast back to the output dtype.
    o_ref[...] = (x * s + b).astype(o_ref.dtype)


def inverse_dataset_transform(x, mean_c, std_c):
    """x: (N, C, H, W), normalized as ([0,1] - mean) / std."""
    n, c, h, w = x.shape
    assert len(mean_c) == c and len(std_c) == c
    hw = h * w
    rows = n * c
    dtype = x.dtype
    itemsize = jnp.dtype(dtype).itemsize

    # Fold *255 into per-channel constants and expand to one value per row of
    # the flattened (N*C, HW) view: row r corresponds to channel r % C.
    scale_c = jnp.asarray([float(s) * 255.0 for s in std_c], dtype=jnp.float32)
    bias_c = jnp.asarray([float(m) * 255.0 for m in mean_c], dtype=jnp.float32)
    scale_rows = jnp.tile(scale_c, n).reshape(rows, 1)
    bias_rows = jnp.tile(bias_c, n).reshape(rows, 1)

    # Lane-dense, sublane-dense layout: (N*C, HW).
    # TODO(synk): callers that already hold a flat (N*C, HW) buffer should pass
    # it directly end-to-end to avoid a possible HBM relayout around these
    # reshapes.
    x2 = x.reshape(rows, hw)

    row_bytes = hw * itemsize
    rb = _choose_row_block(rows, row_bytes)
    grid = (pl.cdiv(rows, rb),)

    x_spec = pl.BlockSpec((rb, hw), lambda i: (i, 0))
    sb_spec = pl.BlockSpec((rb, 1), lambda i: (i, 0))

    out = pl.pallas_call(
        _inverse_transform_kernel,
        out_shape=jax.ShapeDtypeStruct((rows, hw), dtype),
        grid_spec=pltpu.PrefetchScalarGridSpec(
            num_scalar_prefetch=0,
            grid=grid,
            in_specs=[x_spec, sb_spec, sb_spec],
            out_specs=x_spec,
        ),
        compiler_params=pltpu.CompilerParams(
            dimension_semantics=("parallel",)),      # megacore-shardable
        cost_estimate=pl.CostEstimate(
            flops=2 * rows * hw,
            transcendentals=0,
            bytes_accessed=2 * rows * hw * itemsize),
    )(x2, scale_rows, bias_rows)
    return out.reshape(n, c, h, w)


class InverseDatasetTransform:
    """JAX/Pallas port of the PyTorch module."""

    def __init__(self, dataset):
        mean_c, std_c, _ = DATASET_CONFIG[dataset]
        self.mean_c = mean_c
        self.std_c = std_c
        # Kept only for API parity with the original module.
        self.mean, self.std = get_dataset_params(dataset)

    def __call__(self, x):
        return inverse_dataset_transform(x, self.mean_c, self.std_c)


if __name__ == "__main__":
    dataset = "cifar10"
    resol = DATASET_CONFIG[dataset][2]

    # Small deterministic input: batch=2, channels=3, spatial=32.
    key = jax.random.PRNGKey(0)
    x = jax.random.normal(key, (2, 3, resol, resol), dtype=jnp.float32)

    mod = InverseDatasetTransform(dataset)
    out = mod(x)
    out = jax.block_until_ready(out)

    # Correctness check against plain-JAX reference ((x*std + mean)*255).
    mean_map, std_map = get_dataset_params(dataset)
    ref = (x * std_map + mean_map) * 255.0
    assert out.shape == (2, 3, resol, resol)
    assert jnp.allclose(out, ref, atol=1e-3, rtol=1e-5)

    print("KERNEL_OK")
</pallas_src>

<mosaic_0001>
module attributes {stable_mosaic.version = 11 : i64} {
  func.func @_inverse_transform_kernel(%arg0: i32, %arg1: memref<6x1024xf32, #tpu.memory_space<vmem>>, %arg2: memref<6x1xf32, #tpu.memory_space<vmem>>, %arg3: memref<6x1xf32, #tpu.memory_space<vmem>>, %arg4: memref<6x1024xf32, #tpu.memory_space<vmem>>) attributes {dimension_semantics = [#tpu.dimension_semantics<parallel>], iteration_bounds = array<i64: 1>, scalar_prefetch = 0 : i64, scratch_operands = 0 : i64, tpu.core_type = #tpu.core_type<tc>, window_params = [{transform_indices = @transform_0, window_bounds = array<i64: 6, 1024>}, {transform_indices = @transform_1, window_bounds = array<i64: 6, 1>}, {transform_indices = @transform_2, window_bounds = array<i64: 6, 1>}, {transform_indices = @transform_3, window_bounds = array<i64: 6, 1024>}]} {
    %c0 = arith.constant 0 : index
    %c0_0 = arith.constant 0 : index
    %0 = vector.load %arg1[%c0, %c0_0] : memref<6x1024xf32, #tpu.memory_space<vmem>>, vector<6x1024xf32>
    %c0_1 = arith.constant 0 : index
    %c0_2 = arith.constant 0 : index
    %1 = vector.load %arg2[%c0_1, %c0_2] : memref<6x1xf32, #tpu.memory_space<vmem>>, vector<6x1xf32>
    %c0_3 = arith.constant 0 : index
    %c0_4 = arith.constant 0 : index
    %2 = vector.load %arg3[%c0_3, %c0_4] : memref<6x1xf32, #tpu.memory_space<vmem>>, vector<6x1xf32>
    %3 = vector.broadcast %1 : vector<6x1xf32> to vector<6x1024xf32>
    %4 = arith.mulf %0, %3 : vector<6x1024xf32>
    %5 = vector.broadcast %2 : vector<6x1xf32> to vector<6x1024xf32>
    %6 = arith.addf %4, %5 : vector<6x1024xf32>
    %c0_5 = arith.constant 0 : index
    %c0_6 = arith.constant 0 : index
    %7 = vector.load %arg4[%c0_5, %c0_6] : memref<6x1024xf32, #tpu.memory_space<vmem>>, vector<6x1024xf32>
    tpu.vector_store %arg4[%c0_5, %c0_6], %6 {strides = array<i32>} : memref<6x1024xf32, #tpu.memory_space<vmem>>, vector<6x1024xf32>,
    return
  }
  func.func @transform_0(%arg0: i32) -> (i32, i32) {
    %c0_i32 = arith.constant 0 : i32
    %c0_i32_0 = arith.constant 0 : i32
    return %arg0, %c0_i32 : i32, i32
  }
  func.func @transform_1(%arg0: i32) -> (i32, i32) {
    %c0_i32 = arith.constant 0 : i32
    %c0_i32_0 = arith.constant 0 : i32
    return %arg0, %c0_i32 : i32, i32
  }
  func.func @transform_2(%arg0: i32) -> (i32, i32) {
    %c0_i32 = arith.constant 0 : i32
    %c0_i32_0 = arith.constant 0 : i32
    return %arg0, %c0_i32 : i32, i32
  }
  func.func @transform_3(%arg0: i32) -> (i32, i32) {
    %c0_i32 = arith.constant 0 : i32
    %c0_i32_0 = arith.constant 0 : i32
    return %arg0, %c0_i32 : i32, i32
  }
}

</mosaic_0001>

<bundles_post_ra>
// kernel: tpu_custom_call.1
= control target key start
LH: loop header
LB: loop body
LE: loop exit
PB: predicated region body
PF: predicated region fallthrough
CT: control target
= control target key end

     0   :  { %8 = vsyncpa [#allocation3], 0  ;;  %s169_s0 = inlined_call_operand.hbm [shape: f32[6,1024], index: 0, kind: input, shape index: {}]   ;;  %s170_s1 = inlined_call_operand.vmem [shape: f32[6,1], index: 1, kind: input, shape index: {}]   ;;  %s171_s2 = inlined_call_operand.vmem [shape: f32[6,1], index: 2, kind: input, shape index: {}]   ;;  %s172_s3 = inlined_call_operand.hbm [shape: f32[6,1024], index: 3, kind: output, shape index: {}]  }
   0x1   :  { %9 = vsyncpa [#allocation4], 0  ;;  %s134_s12 = smov [#allocation2]  }
   0x2   :  { %s16_s13 = sshll.u32 %s134_s12, 4  ;;  %s17_s13 = int_to_ptr.vmem [resolvable:$true] %s16_s13 }
   0x3   :  { %s98_s14 = scalar_lea.vmem %s17_s13, 1024  ;;  %p103_p1 = scmp.lt.s32.totalorder %s17_s13, %s17_s13 }
   0x4   :  { %p99_p0 = scmp.ne.s32.totalorder %s17_s13, %s98_s14  ;;  %p104_p2 = scmp.lt.s32.totalorder %s98_s14, %s98_s14 }
   0x6   :  { %p105_p3 = por %p104_p2, %p103_p1 }
   0x8   :  { %p106_p4 = pnand %p105_p3, %p99_p0 }
   0xa   :  { %109 = shalt.err (!%p106_p4)
}
   0xb   :  { %19 = dma.hbm_to_vmem [thread:$0]  %s169_s0, 1024, %s17_s13, [#allocation3]  }
   0xc   :  { %130 = dma.done.wait [#allocation3], 1024  }
   0xd   :  { %131 = vsyncadd [#allocation3], 4294966272  ;;  %v135_v0 = vmov 0   ;;  %v35_v1 = vld [vmem:[%s170_s1] sm:$0x3f]  ;;  %s136_s0 = smov [#allocation5]  }
   0xe   :  { %89 = vset.pattern.permute.xlu0 %v135_v0  ;;  %v36_v2 = vld [vmem:[%s171_s2] sm:$0x3f]  ;;  %v28_v4 = vld [vmem:[#allocation2 + $0x8] sm:$0x3f]  ;;  %v29_v5 = vld [vmem:[#allocation2 + $0x10] sm:$0x3f] }
   0xf   :  { %39 = vperm.xlu0 %89, %v35_v1   ;;  %v27_v3 = vld [vmem:[#allocation2] sm:$0x3f]  ;;  %v30_v7 = vld [vmem:[#allocation2 + $0x18] sm:$0x3f]  ;;  %v32_v9 = vld [vmem:[#allocation2 + $0x28] sm:$0x3f] }
  0x10   :  { %v31_v8 = vld [vmem:[#allocation2 + $0x20] sm:$0x3f]  ;;  %v33_v10 = vld [vmem:[#allocation2 + $0x30] sm:$0x3f]  ;;  %v34_v11 = vld [vmem:[#allocation2 + $0x38] sm:$0x3f] }
  0x11   :  { %s77_s1 = sshll.u32 %s136_s0, 4  ;;  %s78_s1 = int_to_ptr.vmem [resolvable:$true] %s77_s1 }
  0x12   :  { %s110_s2 = scalar_lea.vmem %s78_s1, 1024  ;;  %p115_p6 = scmp.lt.s32.totalorder %s78_s1, %s78_s1 }
  0x13   :  { %52 = vperm.xlu0 %89, %v36_v2   ;;  %p111_p5 = scmp.ne.s32.totalorder %s78_s1, %s110_s2  ;;  %p116_p7 = scmp.lt.s32.totalorder %s110_s2, %s110_s2 }
  0x15   :  { %p117_p8 = por %p116_p7, %p115_p6 }
  0x17   :  { %p118_p9 = pnand %p117_p8, %p111_p5 }
  0x8a   :  { %v40_v6 = vpop.permute.xlu0 %39 }
  0x8b   :  { %v42_v12 = vmul.f32 %v40_v6, %v27_v3  ;;  %v43_v13 = vmul.f32 %v40_v6, %v28_v4  ;;  %v44_v14 = vmul.f32 %v40_v6, %v29_v5  ;;  %v45_v15 = vmul.f32 %v40_v6, %v30_v7 }
  0x8c   :  { %v46_v17 = vmul.f32 %v40_v6, %v31_v8  ;;  %v47_v18 = vmul.f32 %v40_v6, %v32_v9  ;;  %v48_v19 = vmul.f32 %v40_v6, %v33_v10  ;;  %v49_v20 = vmul.f32 %v40_v6, %v34_v11 }
  0x8e   :  { %v53_v16 = vpop.permute.xlu0 %52 }
  0x8f   :  { %v55_v21 = vadd.f32 %v53_v16, %v42_v12  ;;  %v56_v22 = vadd.f32 %v53_v16, %v43_v13  ;;  %v57_v23 = vadd.f32 %v53_v16, %v44_v14  ;;  %v58_v24 = vadd.f32 %v53_v16, %v45_v15 }
  0x90   :  { %v59_v25 = vadd.f32 %v53_v16, %v46_v17  ;;  %v60_v26 = vadd.f32 %v53_v16, %v47_v18  ;;  %v61_v27 = vadd.f32 %v53_v16, %v48_v19  ;;  %v62_v28 = vadd.f32 %v53_v16, %v49_v20 }
  0x91   :  { %63 = vst [vmem:[#allocation5] sm:$0x3f] %v55_v21  ;;  %64 = vst [vmem:[#allocation5 + $0x8] sm:$0x3f] %v56_v22 }
  0x92   :  { %65 = vst [vmem:[#allocation5 + $0x10] sm:$0x3f] %v57_v23  ;;  %66 = vst [vmem:[#allocation5 + $0x18] sm:$0x3f] %v58_v24 }
  0x93   :  { %67 = vst [vmem:[#allocation5 + $0x20] sm:$0x3f] %v59_v25  ;;  %68 = vst [vmem:[#allocation5 + $0x28] sm:$0x3f] %v60_v26 }
  0x94   :  { %69 = vst [vmem:[#allocation5 + $0x30] sm:$0x3f] %v61_v27  ;;  %70 = vst [vmem:[#allocation5 + $0x38] sm:$0x3f] %v62_v28 }
  0x95   :  { %121 = shalt.err (!%p118_p9)
}
  0x96   :  { %80 = dma.vmem_to_hbm [thread:$0]  %s78_s1, 1024, %s172_s3, [#allocation4]  }
  0x97   :  { %132 = dma.done.wait [#allocation4], 1024  }
  0x98   :  { %133 = vsyncadd [#allocation4], 4294966272 }
  0x99   :  { %84 = vsyncpa [#allocation3], 1 }
  0x9a   :  { %85 = vsyncpa [#allocation4], 1 }

</bundles_post_ra>
